<compile_context>
chip_gen: v7x
topology: tpu7x:2x2x1
jax: 0.10.0
libtpu: 0.0.40
codegen_flags: <defaults>
</compile_context>

<pallas_src>
import math

import jax
import jax.numpy as jnp
import numpy as np
from jax import lax
from jax.experimental import pallas as pl
from jax.experimental.pallas import tpu as pltpu


def _get_slopes(n_heads: int) -> np.ndarray:
    """Deterministic ALiBi slopes, identical to the PyTorch _get_slopes."""
    n = 2 ** math.floor(math.log2(n_heads))
    m_0 = 2.0 ** (-8.0 / n)
    m = np.power(m_0, np.arange(1, 1 + n, dtype=np.float32))
    if n < n_heads:
        m_hat_0 = 2.0 ** (-4.0 / n)
        m_hat = np.power(m_hat_0, np.arange(1, 1 + 2 * (n_heads - n), 2, dtype=np.float32))
        m = np.concatenate([m, m_hat])
    return m.astype(np.float32)


def _alibi_kernel(slopes_ref, out_ref):
    # slopes_ref: full (H,) vector in SMEM.
    # out_ref:    (1, TI, S) VMEM tile -> head h, query rows [r*TI, r*TI + TI).
    h = pl.program_id(0)
    r = pl.program_id(1)
    rows = out_ref.shape[1]
    cols = out_ref.shape[2]
    row0 = r * rows                                        # scalar row offset of this tile
    i = lax.broadcasted_iota(jnp.int32, (rows, cols), 0)   # local query index -> sublanes
    j = lax.broadcasted_iota(jnp.int32, (rows, cols), 1)   # key index         -> lanes
    dist = jnp.abs(j - i - row0)                           # |j - (row0 + i)|, int32
    # Fold the negation into the scalar slope; convert to f32 exactly once.
    out_ref[0] = (-slopes_ref[h]) * dist.astype(jnp.float32)


def _choose_row_tile(seq_len: int) -> int:
    """Pick a query-row tile: full rows (lane-dense), multiple of 8 sublanes,
    small enough that the double-buffered output tile fits comfortably inside
    the scoped-VMEM defaults of every TPU generation (<= 8 MiB per buffer)."""
    if seq_len % 8 != 0:
        # Odd sizes: whole plane (block == full array dims); only hit for tiny S.
        return seq_len
    per_buffer_budget = 8 * 1024 * 1024            # bytes; x2 for double buffering
    max_rows = max(8, per_buffer_budget // (seq_len * 4))
    ti = min(seq_len, 512, (max_rows // 8) * 8)
    return max(ti, 8)


def alibi_bias(slopes: jax.Array, seq_len: int, *, row_tile: int | None = None) -> jax.Array:
    """Compute the (H, S, S) ALiBi bias tensor with a Pallas TPU kernel."""
    # NOTE: for tiny seq_len (< 128 lanes) stores are masked and plain XLA would
    # be at least as fast; the kernel remains correct there.
    num_heads = slopes.shape[0]
    ti = row_tile if row_tile is not None else _choose_row_tile(seq_len)
    n_row_tiles = pl.cdiv(seq_len, ti)
    return pl.pallas_call(
        _alibi_kernel,
        out_shape=jax.ShapeDtypeStruct((num_heads, seq_len, seq_len), jnp.float32),
        grid_spec=pltpu.PrefetchScalarGridSpec(
            num_scalar_prefetch=0,
            grid=(num_heads, n_row_tiles),
            in_specs=[pl.BlockSpec(memory_space=pltpu.MemorySpace.SMEM)],
            out_specs=pl.BlockSpec((1, ti, seq_len), lambda h, r: (h, r, 0)),
        ),
        compiler_params=pltpu.CompilerParams(
            dimension_semantics=("parallel", "parallel"),
            vmem_limit_bytes=32 * 1024 * 1024,
        ),
    )(slopes)


def _reference(slopes_np: np.ndarray, seq_len: int) -> np.ndarray:
    pos = np.arange(seq_len)
    rel = -np.abs(pos[None, :] - pos[:, None]).astype(np.float32)
    return slopes_np[:, None, None] * rel[None, :, :]


if __name__ == "__main__":
    # The forward pass takes only seq_len; key kept for deterministic-setup convention.
    _ = jax.random.PRNGKey(0)

    # Case 1: small shape matching the module (exercises both slope branches).
    num_heads, seq_len = 6, 8
    slopes_np = _get_slopes(num_heads)
    out = jax.block_until_ready(alibi_bias(jnp.asarray(slopes_np), seq_len))
    np.testing.assert_allclose(np.asarray(out), _reference(slopes_np, seq_len),
                               rtol=1e-6, atol=1e-6)
    assert out.shape == (num_heads, seq_len, seq_len)
    assert out.dtype == jnp.float32

    # Case 2: exercise the tiled (multi row-tile) path and the row-offset logic.
    num_heads2, seq_len2 = 4, 128
    slopes2_np = _get_slopes(num_heads2)
    out2 = jax.block_until_ready(alibi_bias(jnp.asarray(slopes2_np), seq_len2, row_tile=64))
    np.testing.assert_allclose(np.asarray(out2), _reference(slopes2_np, seq_len2),
                               rtol=1e-6, atol=1e-6)
    assert out2.shape == (num_heads2, seq_len2, seq_len2)

    print("KERNEL_OK")
</pallas_src>

<mosaic_0001>
module attributes {stable_mosaic.version = 11 : i64} {
  func.func @_alibi_kernel(%arg0: i32, %arg1: i32, %arg2: memref<6xf32, #tpu.memory_space<smem>>, %arg3: memref<1x8x8xf32, #tpu.memory_space<vmem>>) attributes {dimension_semantics = [#tpu.dimension_semantics<parallel>, #tpu.dimension_semantics<parallel>], iteration_bounds = array<i64: 6, 1>, scalar_prefetch = 0 : i64, scratch_operands = 0 : i64, tpu.core_type = #tpu.core_type<tc>, window_params = [{transform_indices = @transform_0, window_bounds = array<i64: 6>}, {transform_indices = @transform_1, window_bounds = array<i64: 1, 8, 8>}]} {
    %c8_i32 = arith.constant 8 : i32
    %0 = arith.muli %arg1, %c8_i32 : i32
    %1 = tpu.iota {dimensions = array<i32: 0>} : vector<8x8xi32>
    %2 = tpu.iota {dimensions = array<i32: 1>} : vector<8x8xi32>
    %3 = arith.subi %2, %1 : vector<8x8xi32>
    %4 = vector.broadcast %0 : i32 to vector<8x8xi32>
    %5 = arith.subi %3, %4 : vector<8x8xi32>
    %6 = math.absi %5 : vector<8x8xi32>
    %7 = arith.index_cast %arg0 : i32 to index
    %8 = memref.load %arg2[%7] : memref<6xf32, #tpu.memory_space<smem>>
    %cst = arith.constant 0.000000e+00 : f32
    %9 = arith.subf %cst, %8 : f32
    %10 = arith.sitofp %6 : vector<8x8xi32> to vector<8x8xf32>
    %11 = vector.broadcast %9 : f32 to vector<8x8xf32>
    %12 = arith.mulf %11, %10 : vector<8x8xf32>
    %c0 = arith.constant 0 : index
    %c0_0 = arith.constant 0 : index
    %c0_1 = arith.constant 0 : index
    %13 = vector.load %arg3[%c0, %c0_0, %c0_1] : memref<1x8x8xf32, #tpu.memory_space<vmem>>, vector<1x8x8xf32>
    %14 = vector.shape_cast %13 : vector<1x8x8xf32> to vector<8x8xf32>
    %15 = vector.shape_cast %12 : vector<8x8xf32> to vector<1x8x8xf32>
    tpu.vector_store %arg3[%c0, %c0_0, %c0_1], %15 {strides = array<i32>} : memref<1x8x8xf32, #tpu.memory_space<vmem>>, vector<1x8x8xf32>,
    return
  }
  func.func @transform_0(%arg0: i32, %arg1: i32) -> i32 {
    %c0_i32 = arith.constant 0 : i32
    %c0_i32_0 = arith.constant 0 : i32
    return %c0_i32 : i32
  }
  func.func @transform_1(%arg0: i32, %arg1: i32) -> (i32, i32, i32) {
    %c0_i32 = arith.constant 0 : i32
    %c0_i32_0 = arith.constant 0 : i32
    return %arg0, %arg1, %c0_i32 : i32, i32, i32
  }
}

</mosaic_0001>

<bundles_post_ra>
// kernel: tpu_custom_call.1
= control target key start
LH: loop header
LB: loop body
LE: loop exit
PB: predicated region body
PF: predicated region fallthrough
CT: control target
= control target key end

     0   :  { %6 = vsyncpa [#allocation4], 0  ;;  %s547_s0 = inlined_call_operand.hbm [shape: f32[6], index: 0, kind: input, shape index: {}]   ;;  %s548_s1 = inlined_call_operand.hbm [shape: f32[6,8,8], index: 1, kind: output, shape index: {}]  }
   0x1   :  { %7 = vsyncpa [#allocation3], 0 }
   0x2   :  { %9 = vsyncpa [#allocation3 + $0x1], 0  ;;  %s409_s6 = smov 0   ;;  %s411_s7 = smov 0  }
   0x3   :  { %s413_s8 = smov 0   ;;  %s415_s9 = smov 0  }
   0x4   :  { %s417_s10 = smov 0   ;;  %s419_s11 = smov 0  }
   0x5 LB: > { %s222_s12 = sadd.s32 4294967295, %s395_s11   ;;  %s223_s13 = sadd.s32 4294967294, %s395_s11   ;;  %s395_s11 = sphi %s419_s11, %s15_s11   ;;  %s391_s10 = sphi %s417_s10, %s557_s10   ;;  %s387_s9 = sphi %s415_s9, %s556_s9   ;;  %s383_s8 = sphi %s413_s8, %s555_s8   ;;  %s379_s7 = sphi %s411_s7, %s554_s7   ;;  %s375_s6 = sphi %s409_s6, %s553_s6  }
   0x6   : > { %s27_s14 = sadd.s32 1, %s391_s10  ;;  %s57_s15 = sadd.s32 1, %s383_s8 }
   0x7   : > { %p29_p0 = scmp.ge.s32.totalorder %s27_s14, 6  ;;  %p67_p1 = scmp.ne.s32.totalorder %s383_s8, %s379_s7 }
   0x8   : > { %p68_p2 = scmp.eq.s32.totalorder %s222_s12, 5  ;;  %p73_p3 = scmp.ne.s32.totalorder %s379_s7, %s375_s6 }
   0x9   : > { %s559_s14 = smov (%p29_p0, %s27_s14), 0  ;;  %p74_p5 = scmp.eq.s32.totalorder %s223_s13, 5 }
   0xa   : > { %p449_p4 = por %p68_p2, %p67_p1  ;;  %s52_s17 = ssub.s32 %s391_s10, %s559_s14 }
   0xb   : > { %p224_p6 = scmp.ge.s32.totalorder %s395_s11, 1  ;;  %p55_p7 = scmp.eq.s32.totalorder %s52_s17, 0 }
   0xc   : > { %p456_p8 = por %p74_p5, %p73_p3  ;;  %p81_p9 = scmp.lt.s32.totalorder %s395_s11, 7 }
   0xd   : > { %s462_s19 = scalar_select %p55_p7, %s383_s8, %s57_s15  }
   0xe   : > { %p464_p10 = pnand %p224_p6, %p81_p9  ;;  %p468_p11 = scmp.eq.s32.totalorder %s222_s12, 0 }
   0xf   : > { %s300_s24 = scalar_lea.hbm %s547_s0, 16 }
  0x10   : > { %p240_p12 = pneg %p464_p10  ;;  %p301_p0 = scmp.ne.s32.totalorder %s547_s0, %s300_s24 }
  0x11   : > { %p307_p5 = scmp.lt.u32.totalorder %s300_s24, %s547_s0 }
  0x12   : > { %p241_p13 = pnand %p468_p11, %p240_p12 }
  0x14   : > { %p302_p1 = pneg %p241_p13 }
  0x16   : > { %p303_p2 = pnand %p302_p1, %p301_p0 }
  0x18   : > { %p304_p3 = pneg %p303_p2 }
  0x1a   : > { %p309_p6 = pnand %p307_p5, %p304_p3 }
  0x1c   : > { %312 = shalt.err (!%p309_p6)
}
  0x1d   : > { %s397_s29 = smov [#allocation2]   ;;  %105 = sbr.rel (%p464_p10) target bundleno = 67 (0x43), region = 24 }
  0x1e   : > { %243 = dma.hbm_to_smem (!%p241_p13), %s547_s0, 16, %s397_s29, [#allocation4]  }
  0x24   : > { %366 = dma.done.wait (%p468_p11), [#allocation4], 16  }
  0x25   : > { %368 = vsyncadd (%p468_p11), [#allocation4], 4294967280 }
  0x26   : > { %111 = sfence }
  0x27   : > { %s118_s3 = sand.u32 1, %s379_s7   ;;  %v122_v0 = vlaneseq  ;;  %s132_s4 = sld [smem:[#allocation2 + %s387_s9]]  ;;  %vm137_vm0 = vcmask 64512  }
  0x28   : > { %s228_s5 = sshll.u32 %s118_s3, 3  ;;  %s231_s17 = sshll.u32 %s387_s9, 7 }
  0x29   : > { %v123_v1 = vshrl.u32 %v122_v0, 7  ;;  %v125_v2 = vand.u32 127, %v122_v0  ;;  %s120_s13 = scalar_lea.vmem [#allocation5], %s228_s5  ;;  %s502_s22 = scalar_lea.hbm %s548_s1, %s231_s17 }
  0x2a   : > { %s154_s15 = sshll.u32 %s120_s13, 4  ;;  %s140_s23 = scalar_lea.sflag [#allocation3], %s118_s3  ;;  %s497_s15 = int_to_ptr.vmem [resolvable:$true] %s154_s15 }
  0x2b   : > { %v126_v3 = vsub.s32 %v125_v2, %v123_v1  ;;  %s313_s24 = scalar_lea.vmem %s497_s15, 128  ;;  %s398_s9 = smov [#allocation5]  }
  0x2c   : > { %p314_p7 = scmp.ne.s32.totalorder %s497_s15, %s313_s24  ;;  %s317_s25 = sshll.u32 %s398_s9, 4  ;;  %s318_s25 = int_to_ptr.vmem [resolvable:$false] %s317_s25 }
  0x2d   : > { %v130_v4 = vsub.s32 0, %v126_v3  ;;  %s133_s12 = ssub.f32 0.0, %s132_s4  ;;  %s319_s26 = scalar_lea.vmem %s318_s25, 256 }
  0x2e   : > { %p315_p9 = pnand %p314_p7, %p449_p4  ;;  %p320_p11 = scmp.lt.s32.totalorder %s497_s15, %s318_s25 }
  0x2f   : > { %v229_v5 = vmin.u32 %v130_v4, %v126_v3  ;;  %v135_v6 = vstv %s133_s12  ;;  %p321_p12 = scmp.lt.s32.totalorder %s319_s26, %s313_s24 }
  0x30   : > { %p316_p10 = pneg %p315_p9 }
  0x31   : > { %v134_v7 = vcvt.s32.f32 %v229_v5  ;;  %p322_p13 = por %p321_p12, %p320_p11 }
  0x33   : > { %v136_v8 = vmul.f32 %v135_v6, %v134_v7  ;;  %p323_p0 = pnand %p322_p13, %p316_p10 }
  0x35   : > { %138 = vst.msk [vmem:[%s120_s13] sm:$0xff] %vm137_vm0, %v136_v8 }
  0x36   : > { %326 = shalt.err (!%p323_p0)
}
  0x37   : > { %s327_s27 = scalar_lea.hbm %s502_s22, 128  ;;  %s331_s30 = scalar_lea.hbm %s548_s1, 768 }
  0x38   : > { %p328_p1 = scmp.ne.s32.totalorder %s502_s22, %s327_s27  ;;  %p332_p5 = scmp.lt.u32.totalorder %s502_s22, %s548_s1 }
  0x39   : > { %p333_p6 = scmp.lt.u32.totalorder %s331_s30, %s327_s27  ;;  %p335_p9 = scmp.lt.u32.totalorder %s327_s27, %s502_s22 }
  0x3a   : > { %p329_p2 = pnand %p328_p1, %p449_p4 }
  0x3b   : > { %p334_p7 = por %p333_p6, %p332_p5 }
  0x3c   : > { %p330_p3 = pneg %p329_p2 }
  0x3d   : > { %p336_p10 = por %p335_p9, %p334_p7 }
  0x3f   : > { %p337_p11 = pnand %p336_p10, %p330_p3 }
  0x41   : > { %340 = shalt.err (!%p337_p11)
}
  0x42   : > { %238 = dma.vmem_to_hbm [thread:$0]  (%p449_p4), %s497_s15, 128, %s502_s22, %s140_s23  }
  0x43 PF: > { %p250_p12 = scmp.ge.s32.totalorder %s395_s11, 2  ;;  %s166_s4 = sand.u32 1, %s375_s6  }
  0x44   : > { %s167_s5 = scalar_lea.sflag [#allocation3], %s166_s4 }
  0x45   : > { %p245_p13 = pnand %p250_p12, %p456_p8 }
  0x47   : > { %370 = dma.done.wait (!%p245_p13), %s167_s5, 128  }
  0x48   : > { %372 = vsyncadd (!%p245_p13), %s167_s5, 4294967168  ;;  %s15_s11 = sadd.s32 1, %s395_s11   ;;  %s553_s6 = smov %s379_s7 }
  0x49   : > { %p12_p0 = scmp.ge.s32.totalorder %s15_s11, 8   ;;  %s554_s7 = smov %s383_s8 }
  0x4a   : > { %s555_s8 = smov %s462_s19  ;;  %s556_s9 = smov %s391_s10 }
  0x4b   : > { %s557_s10 = smov %s559_s14  ;;  %14 = sbr.rel (!%p12_p0) target bundleno = 5 (0x5), region = 61 }
  0x52   :  { %172 = vsyncpa [#allocation3], 1 }
  0x53   :  { %174 = vsyncpa [#allocation3 + $0x1], 1 }
  0x54   :  { %175 = vsyncpa [#allocation4], 1 }
  0x55   :  { %177 = vsyncpa [#allocation4 + $0x1], 1 }

</bundles_post_ra>
